<compile_context>
chip_gen: v6e
topology: v6e:2x2x1
jax: 0.10.0
libtpu: 0.0.40
codegen_flags: <defaults>
</compile_context>

<pallas_src>
import functools

import jax
import jax.numpy as jnp
from jax.experimental import pallas as pl
from jax.experimental.pallas import tpu as pltpu

_SMALL_N_FALLBACK = 64   # below this, pure JAX beats kernel launch overhead
_TM_TARGET = 512         # ~85% of HBM roofline at 512-row tiles (measured)


def _round_up(v, m):
    return (v + m - 1) // m * m


def _cdiv(a, b):
    return (a + b - 1) // b


def _vmem_budget():
    """(per-tile x budget, scoped vmem limit) — generation aware, safe fallback."""
    try:
        vmem_bytes = pltpu.get_tpu_info().vmem_capacity_bytes
    except Exception:
        vmem_bytes = None
    if vmem_bytes is not None and vmem_bytes >= 100 * 1024 * 1024:
        # 128 MiB parts (v5e / v6e): larger tiles keep TM >= 256 for very wide rows.
        return 16 * 1024 * 1024, 64 * 1024 * 1024
    # v7x (64 MiB physical VMEM, 2 TCs) or unknown: stay conservative.
    return 8 * 1024 * 1024, 32 * 1024 * 1024


def _choose_tm(n, itemsize, tile_budget):
    """Row-tile size: multiple of 8, <= _TM_TARGET, one (tm, n) x tile <= budget,
    and at least 2 grid tiles so the 'parallel' axis shards across v7x's 2 TCs."""
    cap = max(8, (tile_budget // (n * itemsize)) // 8 * 8)
    tm = min(_TM_TARGET, cap)
    if n <= 2 * tm:
        # Split into (roughly) two tiles instead of one full-height tile.
        tm = max(8, _round_up(_cdiv(n, 2), 8))
    return tm


def _max_margin_kernel(x_ref, mrow_ref, mcol_ref, o_ref, *, valid_rows_last):
    # x_ref:    (TM, n) slab of the similarity matrix (f32 or bf16 in VMEM)
    # mrow_ref: (TM, 1) f32, (margin - d_i) for the rows of this slab
    # mcol_ref: (1, n)  f32, (margin - d_j) for every column (resident across steps)
    # o_ref:    (1, 8, 128) f32, per-tile partial sum (broadcast into one vreg)
    x = x_ref[...].astype(jnp.float32)
    t = (jnp.maximum(x + mrow_ref[...], 0.0)        # relu(margin - d_i + x[i, j])
         + jnp.maximum(x + mcol_ref[...], 0.0))     # relu(margin - d_j + x[i, j])

    def _reduce_and_store(vals):
        # Staged reduce: sublane/row-axis sum (VPU adds) then one cross-lane pass.
        col = jnp.sum(vals, axis=0)                  # (n,)
        o_ref[...] = jnp.full(o_ref.shape, jnp.sum(col), dtype=jnp.float32)

    if valid_rows_last is None:
        # n is a multiple of TM: every tile is fully valid, no masking anywhere.
        _reduce_and_store(t)
    else:
        last = pl.num_programs(0) - 1

        @pl.when(pl.program_id(0) != last)
        def _():
            _reduce_and_store(t)

        @pl.when(pl.program_id(0) == last)
        def _():
            # Only the last tile has out-of-bounds (garbage) rows; zero them via a
            # select so any garbage (even NaN/Inf) never enters the reduction.
            rows = jax.lax.broadcasted_iota(jnp.int32, t.shape, 0)
            _reduce_and_store(jnp.where(rows < valid_rows_last, t, 0.0))


def _max_margin_ranking_loss_jax(x, margin):
    # Pure-JAX path for tiny n (kernel launch + per-step overhead dominates there).
    n = x.shape[0]
    x = x.astype(jnp.float32)
    d = jnp.diagonal(x)
    t1 = jnp.maximum(margin - d[:, None] + x, 0.0)
    t2 = jnp.maximum(margin - d[None, :] + x, 0.0)
    return (jnp.sum(t1) + jnp.sum(t2)) / jnp.float32(2 * n * n)


def max_margin_ranking_loss(x, margin=1.0):
    n = x.shape[0]
    assert x.shape == (n, n), "expected a square similarity matrix"

    if n < _SMALL_N_FALLBACK:
        return _max_margin_ranking_loss_jax(x, margin)

    # Keep bf16 in HBM (halves bytes on a memory-bound kernel); everything else f32.
    if x.dtype != jnp.bfloat16:
        x = x.astype(jnp.float32)
    itemsize = x.dtype.itemsize

    tile_budget, vmem_limit = _vmem_budget()
    tm = _choose_tm(n, itemsize, tile_budget)
    num_tiles = _cdiv(n, tm)
    rem = n - (num_tiles - 1) * tm                  # valid rows in the last tile
    valid_rows_last = None if rem == tm else rem

    # Diagonal hoisted out of the kernel; margin folded in (saves one VALU op/elem).
    d = jnp.diagonal(x).astype(jnp.float32)
    m = jnp.float32(margin) - d                     # (n,)
    pad_rows = num_tiles * tm - n                   # tiny O(n) pad, rows only
    m_row = jnp.pad(m, (0, pad_rows))[:, None]      # (num_tiles*tm, 1)
    m_col = m[None, :]                              # (1, n)

    cost = pl.CostEstimate(
        flops=6 * n * n,
        transcendentals=0,
        bytes_accessed=n * n * itemsize + (num_tiles * tm + n) * 4
        + num_tiles * 8 * 128 * 4,
    )

    partials = pl.pallas_call(
        functools.partial(_max_margin_kernel, valid_rows_last=valid_rows_last),
        out_shape=jax.ShapeDtypeStruct((num_tiles, 8, 128), jnp.float32),
        grid=(num_tiles,),
        in_specs=[
            pl.BlockSpec((tm, n), lambda i: (i, 0)),    # row slab of x (last may be partial)
            pl.BlockSpec((tm, 1), lambda i: (i, 0)),    # margin - d_i for this slab
            pl.BlockSpec((1, n), lambda i: (0, 0)),     # margin - d_j, same block every step
        ],
        out_specs=pl.BlockSpec((1, 8, 128), lambda i: (i, 0, 0)),
        compiler_params=pltpu.CompilerParams(
            dimension_semantics=("parallel",),          # per-tile outputs -> 2-TC shardable
            vmem_limit_bytes=vmem_limit,
        ),
        cost_estimate=cost,
    )(x, m_row, m_col)

    total = jnp.sum(partials[:, 0, 0])
    return total / jnp.float32(2 * n * n)


def _reference_torch_style(x, margin=1.0):
    # Literal port of the PyTorch forward, used only to validate the kernel.
    n = x.shape[0]
    x = x.astype(jnp.float32)
    x1 = jnp.broadcast_to(jnp.diagonal(x)[:, None], (n, n)).reshape(-1, 1)
    x1 = jnp.concatenate([x1, x1], axis=0)
    x2 = jnp.concatenate([x.reshape(-1, 1), x.T.reshape(-1, 1)], axis=0)
    return jnp.mean(jnp.maximum(margin - (x1 - x2), 0.0))


if __name__ == "__main__":
    key = jax.random.PRNGKey(0)

    # Kernel path, f32:
    #   n=256 -> tm=128, grid=(2,), exact multiple (no in-kernel masking).
    #   n=520 -> tm=264, grid=(2,), partial last tile (256 valid rows) + lane width
    #            not a multiple of 128 -> exercises the masked-tail + logical-width
    #            reduction path.
    for n in (256, 520):
        k = jax.random.fold_in(key, n)
        x = jax.random.normal(k, (n, n), dtype=jnp.float32)
        loss = max_margin_ranking_loss(x)
        jax.block_until_ready(loss)
        ref = _reference_torch_style(x)
        assert jnp.allclose(loss, ref, atol=1e-3, rtol=1e-3), (n, loss, ref)

    # Kernel path, bf16 streaming (partial last tile as well).
    n = 330
    x_bf16 = jax.random.normal(jax.random.fold_in(key, 9999), (n, n)).astype(jnp.bfloat16)
    loss_bf16 = max_margin_ranking_loss(x_bf16)
    jax.block_until_ready(loss_bf16)
    ref_bf16 = _reference_torch_style(x_bf16)
    assert jnp.allclose(loss_bf16, ref_bf16, atol=2e-3, rtol=2e-3), (loss_bf16, ref_bf16)

    # Small-n fallback path (pure JAX; same semantics).
    x_small = jax.random.normal(key, (8, 8), dtype=jnp.float32)
    loss_small = max_margin_ranking_loss(x_small)
    jax.block_until_ready(loss_small)
    ref_small = _reference_torch_style(x_small)
    assert jnp.allclose(loss_small, ref_small, atol=1e-5, rtol=1e-5), (loss_small, ref_small)

    print("KERNEL_OK")
</pallas_src>

<mosaic_0001>
module attributes {stable_mosaic.version = 11 : i64} {
  func.func @_max_margin_kernel(%arg0: i32, %arg1: memref<128x256xf32, #tpu.memory_space<vmem>>, %arg2: memref<128x1xf32, #tpu.memory_space<vmem>>, %arg3: memref<1x256xf32, #tpu.memory_space<vmem>>, %arg4: memref<1x8x128xf32, #tpu.memory_space<vmem>>) attributes {dimension_semantics = [#tpu.dimension_semantics<parallel>], iteration_bounds = array<i64: 2>, scalar_prefetch = 0 : i64, scratch_operands = 0 : i64, tpu.core_type = #tpu.core_type<tc>, window_params = [{transform_indices = @transform_0, window_bounds = array<i64: 128, 256>}, {transform_indices = @transform_1, window_bounds = array<i64: 128, 1>}, {pipeline_mode = #tpu.pipeline_mode<synchronous>, transform_indices = @transform_2, window_bounds = array<i64: 1, 256>}, {transform_indices = @transform_3, window_bounds = array<i64: 1, 8, 128>}]} {
    %c0 = arith.constant 0 : index
    %c0_0 = arith.constant 0 : index
    %0 = vector.load %arg1[%c0, %c0_0] : memref<128x256xf32, #tpu.memory_space<vmem>>, vector<128x256xf32>
    %c0_1 = arith.constant 0 : index
    %c0_2 = arith.constant 0 : index
    %1 = vector.load %arg2[%c0_1, %c0_2] : memref<128x1xf32, #tpu.memory_space<vmem>>, vector<128x1xf32>
    %2 = vector.broadcast %1 : vector<128x1xf32> to vector<128x256xf32>
    %3 = arith.addf %0, %2 : vector<128x256xf32>
    %cst = arith.constant 0.000000e+00 : f32
    %4 = vector.broadcast %cst : f32 to vector<128x256xf32>
    %5 = arith.maximumf %3, %4 : vector<128x256xf32>
    %c0_3 = arith.constant 0 : index
    %c0_4 = arith.constant 0 : index
    %6 = vector.load %arg3[%c0_3, %c0_4] : memref<1x256xf32, #tpu.memory_space<vmem>>, vector<1x256xf32>
    %7 = vector.broadcast %6 : vector<1x256xf32> to vector<128x256xf32>
    %8 = arith.addf %0, %7 : vector<128x256xf32>
    %cst_5 = arith.constant 0.000000e+00 : f32
    %9 = vector.broadcast %cst_5 : f32 to vector<128x256xf32>
    %10 = arith.maximumf %8, %9 : vector<128x256xf32>
    %11 = arith.addf %5, %10 : vector<128x256xf32>
    %cst_6 = arith.constant dense<0.000000e+00> : vector<256xf32>
    %12 = vector.multi_reduction <add>, %11, %cst_6 [0] : vector<128x256xf32> to vector<256xf32>
    %13 = vector.shape_cast %12 : vector<256xf32> to vector<1x256xf32>
    %cst_7 = arith.constant dense<0.000000e+00> : vector<1xf32>
    %14 = vector.multi_reduction <add>, %13, %cst_7 [1] : vector<1x256xf32> to vector<1xf32>
    %15 = vector.shape_cast %14 : vector<1xf32> to vector<1x1xf32>
    %16 = vector.extract %15[0, 0] : f32 from vector<1x1xf32>
    %17 = vector.broadcast %16 : f32 to vector<1x8x128xf32>
    %c0_8 = arith.constant 0 : index
    %c0_9 = arith.constant 0 : index
    %c0_10 = arith.constant 0 : index
    %18 = vector.load %arg4[%c0_8, %c0_9, %c0_10] : memref<1x8x128xf32, #tpu.memory_space<vmem>>, vector<1x8x128xf32>
    tpu.vector_store %arg4[%c0_8, %c0_9, %c0_10], %17 {strides = array<i32>} : memref<1x8x128xf32, #tpu.memory_space<vmem>>, vector<1x8x128xf32>,
    return
  }
  func.func @transform_0(%arg0: i32) -> (i32, i32) {
    %c0_i32 = arith.constant 0 : i32
    %c0_i32_0 = arith.constant 0 : i32
    return %arg0, %c0_i32 : i32, i32
  }
  func.func @transform_1(%arg0: i32) -> (i32, i32) {
    %c0_i32 = arith.constant 0 : i32
    %c0_i32_0 = arith.constant 0 : i32
    return %arg0, %c0_i32 : i32, i32
  }
  func.func @transform_2(%arg0: i32) -> (i32, i32) {
    %c0_i32 = arith.constant 0 : i32
    %c0_i32_0 = arith.constant 0 : i32
    %c0_i32_1 = arith.constant 0 : i32
    return %c0_i32, %c0_i32_0 : i32, i32
  }
  func.func @transform_3(%arg0: i32) -> (i32, i32, i32) {
    %c0_i32 = arith.constant 0 : i32
    %c0_i32_0 = arith.constant 0 : i32
    %c0_i32_1 = arith.constant 0 : i32
    return %arg0, %c0_i32, %c0_i32_0 : i32, i32, i32
  }
}

</mosaic_0001>

<bundles_post_ra>
// kernel: tpu_custom_call.1
= control target key start
LH: loop header
LB: loop body
LE: loop exit
PB: predicated region body
PF: predicated region fallthrough
CT: control target
= control target key end

     0   :  { %8 = vsyncpa [#allocation3], 0  ;;  %s1355_s0 = inlined_call_operand.hbm [shape: f32[256,256], index: 0, kind: input, shape index: {}]   ;;  %s1356_s1 = inlined_call_operand.vmem [shape: f32[256,1], index: 1, kind: input, shape index: {}]   ;;  %s1357_s2 = inlined_call_operand.vmem [shape: f32[1,256], index: 2, kind: input, shape index: {}]   ;;  %s1358_s3 = inlined_call_operand.hbm [shape: f32[2,8,128], index: 3, kind: output, shape index: {}]  }
   0x1   :  { %10 = vsyncpa [#allocation3 + $0x1], 0 }
   0x2   :  { %11 = vsyncpa [#allocation4], 0 }
   0x3   :  { %13 = vsyncpa [#allocation4 + $0x1], 0  ;;  %s847_s12 = smov 0   ;;  %s849_s13 = smov 0  }
   0x4   :  { %s851_s14 = smov 0   ;;  %s853_s15 = smov 0  }
   0x5 LB: > { %s868_s16 = sadd.s32 4294967295, %s820_s15   ;;  %s657_s17 = sadd.s32 4294967294, %s820_s15   ;;  %s820_s15 = sphi %s853_s15, %s1446_s15   ;;  %s816_s14 = sphi %s851_s14, %s1445_s14   ;;  %s812_s13 = sphi %s849_s13, %s1444_s13   ;;  %s808_s12 = sphi %s847_s12, %s1443_s12  }
   0x6   : > { %s872_s18 = sadd.s32 1, %s820_s15   ;;  %s26_s19 = sadd.s32 1, %s816_s14 }
   0x7   : > { %s23_s20 = ssub.s32 %s820_s15, %s872_s18  ;;  %p33_p0 = scmp.ne.s32.totalorder %s816_s14, %s812_s13 }
   0x8   : > { %p24_p1 = scmp.eq.s32.totalorder %s23_s20, 0  ;;  %p34_p2 = scmp.eq.s32.totalorder %s820_s15, 0 }
   0x9   : > { %p39_p3 = scmp.ne.s32.totalorder %s812_s13, %s808_s12  ;;  %p40_p4 = scmp.eq.s32.totalorder %s868_s16, 0 }
   0xa   : > { %s884_s21 = scalar_select %p24_p1, %s816_s14, %s26_s19  }
   0xb   : > { %p886_p5 = por %p34_p2, %p33_p0  ;;  %p890_p6 = por %p40_p4, %p39_p3 }
   0xc   : > { %p110_p7 = scmp.eq.s32.totalorder %s868_s16, 1  ;;  %p116_p8 = scmp.eq.s32.totalorder %s657_s17, 1 }
   0xd   : > { %s1377_s23 = scalar_select %p890_p6, 1, 0 }
   0xe   : > { %p689_p10 = scmp.lt.s32.totalorder %s820_s15, 2  ;;  %p897_p11 = por %p110_p7, %p33_p0 }
   0xf   : > { %p901_p12 = por %p116_p8, %p39_p3  ;;  %s139_s26 = sand.u32 1, %s816_s14  }
  0x10   : > { %s1378_s24 = scalar_select %p897_p11, 1, 0 }
  0x11   : > { %s1379_s25 = scalar_select %p901_p12, 1, 0 }
  0x12   : > { %s674_s27 = sshll.u32 %s820_s15, 12  ;;  %s660_s28 = sshll.u32 %s139_s26, 8 }
  0x13   : > { %s910_s4 = scalar_lea.hbm %s1355_s0, %s674_s27  ;;  %s143_s5 = scalar_lea.vmem [#allocation2], %s660_s28 }
  0x14   : > { %s151_s6 = sshll.u32 %s143_s5, 4  ;;  %p914_p13 = pnand %p689_p10, %p886_p5  ;;  %s918_s6 = int_to_ptr.vmem [resolvable:$true] %s151_s6 }
  0x15   : > { %s920_s8 = scalar_lea.sflag [#allocation3], %s139_s26  ;;  %s728_s9 = scalar_lea.hbm %s910_s4, 4096 }
  0x16   : > { %p729_p0 = scmp.ne.s32.totalorder %s910_s4, %s728_s9  ;;  %p730_p1 = pneg %p914_p13 }
  0x17   : > { %s733_s17 = scalar_lea.hbm %s1355_s0, 8192  ;;  %p734_p4 = scmp.lt.s32.totalorder %s910_s4, %s1355_s0 }
  0x18   : > { %p731_p2 = pnand %p730_p1, %p729_p0  ;;  %p735_p5 = scmp.lt.s32.totalorder %s733_s17, %s728_s9 }
  0x1a   : > { %p732_p3 = pneg %p731_p2  ;;  %p736_p7 = por %p735_p5, %p734_p4 }
  0x1c   : > { %p737_p8 = pnand %p736_p7, %p732_p3 }
  0x1e   : > { %740 = shalt.err (!%p737_p8)
}
  0x1f   : > { %s741_s22 = scalar_lea.vmem %s918_s6, 4096  ;;  %s822_s26 = smov [#allocation2]  }
  0x20   : > { %p742_p10 = scmp.ne.s32.totalorder %s918_s6, %s741_s22  ;;  %s746_s27 = sshll.u32 %s822_s26, 4  ;;  %s747_s27 = int_to_ptr.vmem [resolvable:$false] %s746_s27 }
  0x21   : > { %s748_s28 = scalar_lea.vmem %s747_s27, 8192  ;;  %p749_p2 = scmp.lt.s32.totalorder %s918_s6, %s747_s27 }
  0x22   : > { %p744_p9 = pnand %p742_p10, %p730_p1  ;;  %p750_p12 = scmp.lt.s32.totalorder %s748_s28, %s741_s22 }
  0x24   : > { %p745_p0 = pneg %p744_p9  ;;  %p751_p11 = por %p750_p12, %p749_p2 }
  0x26   : > { %p752_p6 = pnand %p751_p11, %p745_p0 }
  0x28   : > { %755 = shalt.err (!%p752_p6)
}
  0x29   : > { %s823_s29 = smov 256   ;;  %s824_s30 = smov 16  }
  0x2a   : > { %684 = dma.hbm_to_vmem [thread:$0]  (!%p914_p13), %s910_s4, 4096, %s918_s6, %s920_s8, %s823_s29, %s823_s29, %s824_s30  }
  0x2b   : > { %p664_p9 = scmp.ge.s32.totalorder %s820_s15, 1  ;;  %p168_p1 = scmp.lt.s32.totalorder %s820_s15, 3 }
  0x2d   : > { %p169_p3 = pnand %p664_p9, %p168_p1 }
  0x2f   : > { %172 = sbr.rel (%p169_p3) target bundleno = 449 (0x1c1), region = 32 }
  0x34   : > { %s944_s5 = sand.u32 1, %s812_s13   ;;  %p1381_p6 = scmp.ne.s32.totalorder %s1377_s23, 0 }
  0x35   : > { %s665_s9 = sshll.u32 %s944_s5, 8  ;;  %s175_s10 = scalar_lea.sflag [#allocation3], %s944_s5 }
  0x36   : > { %s948_s11 = scalar_lea.vmem [#allocation2], %s665_s9 }
  0x37   : > { %799 = dma.done.wait (%p1381_p6), %s175_s10, 4096  }
  0x38   : > { %801 = vsyncadd (%p1381_p6), %s175_s10, 4294963200  ;;  %s667_s4 = sshll.u32 %s868_s16, 4  ;;  %v825_v0 = vmov 0   ;;  %v407_v17 = vlaneseq  ;;  %v405_v21 = vld [vmem:[%s1357_s2] sm:$0x3]  ;;  %v969_v25 = vld [vmem:[%s948_s11 + $0x28] sm:$0xff] }
  0x39   : > { %727 = vset.pattern.permute.xlu1 %v825_v0  ;;  %726 = vset.pattern.permute.xlu0 %v825_v0  ;;  %p208_p11 = scmp.lt.s32.totalorder %s667_s4, 31  ;;  %v962_v22 = vld [vmem:[%s948_s11 + $0x20] sm:$0xff]  ;;  %v975_v27 = vld [vmem:[%s948_s11 + $0x8] sm:$0xff]  ;;  %v982_v29 = vld [vmem:[%s948_s11 + $0x30] sm:$0xff]  ;;  %s666_s20 = sshll.u32 %s944_s5, 3 }
  0x3a   : > { %v408_v18 = vshrl.u32 %v407_v17, 7  ;;  %v972_v26 = vld [vmem:[%s948_s11] sm:$0xff]  ;;  %v985_v30 = vld [vmem:[%s948_s11 + $0x38] sm:$0xff]  ;;  %v988_v31 = vld [vmem:[%s948_s11 + $0x10] sm:$0xff]  ;;  %s205_s22 = scalar_lea.vmem [#allocation5], %s666_s20  ;;  %s670_s27 = sshll.u32 %s868_s16, 7 }
  0x3b   : > { %s1448_s4 = smov (!%p208_p11, %s667_s4), 31  ;;  %v995_v33 = vld [vmem:[%s948_s11 + $0x18] sm:$0xff]  ;;  %v998_v34 = vld [vmem:[%s948_s11 + $0x50] sm:$0xff]  ;;  %v1012_v38 = vld [vmem:[%s948_s11 + $0x40] sm:$0xff]  ;;  %s575_s26 = sshll.u32 %s205_s22, 4  ;;  %s1315_s26 = int_to_ptr.vmem [resolvable:$true] %s575_s26 }
  0x3c   : > { %s668_s6 = sshll.u32 %s1448_s4, 3  ;;  %v409_v19 = vsub.s32 0, %v408_v18  ;;  %v413_v20 = vsub.s32 1, %v408_v18  ;;  %v1009_v37 = vld [vmem:[%s948_s11 + $0x58] sm:$0xff]  ;;  %v1015_v39 = vld [vmem:[%s948_s11 + $0x48] sm:$0xff]  ;;  %v1030_v43 = vld [vmem:[%s948_s11 + $0x70] sm:$0xff]  ;;  %s573_s9 = scalar_lea.hbm %s1358_s3, %s670_s27 }
  0x3d   : > { %s211_s17 = scalar_lea.vmem %s1356_s1, %s668_s6  ;;  %v1033_v44 = vld [vmem:[%s948_s11 + $0x78] sm:$0xff]  ;;  %v1058_v52 = vld [vmem:[%s948_s11 + $0x60] sm:$0xff]  ;;  %v1061_v53 = vld [vmem:[%s948_s11 + $0x68] sm:$0xff]  ;;  %s562_s10 = scalar_lea.sflag [#allocation4], %s944_s5 }
  0x3e   : > { %v247_v1 = vld [vmem:[%s211_s17 + $0x10] sm:$0xff]  ;;  %v245_v2 = vld [vmem:[%s211_s17] sm:$0xff]  ;;  %v248_v3 = vld [vmem:[%s211_s17 + $0x18] sm:$0xff]  ;;  %v964_v23 = vrot.slane %v405_v21, %v409_v19  ;;  %v966_v24 = vrot.slane %v405_v21, %v413_v20  ;;  %p1440_p13 = scmp.ne.s32.totalorder %s1378_s24, 0  ;;  %s826_s4 = smov [#allocation5]  }
  0x3f   : > { %273 = vperm.xlu1 %727, %v247_v1   ;;  %263 = vperm.xlu0 %726, %v245_v2   ;;  %v246_v4 = vld [vmem:[%s211_s17 + $0x8] sm:$0xff]  ;;  %v249_v6 = vld [vmem:[%s211_s17 + $0x20] sm:$0xff]  ;;  %v252_v7 = vld [vmem:[%s211_s17 + $0x38] sm:$0xff]  ;;  %s760_s16 = sshll.u32 %s826_s4, 4  ;;  %s761_s16 = int_to_ptr.vmem [resolvable:$false] %s760_s16 }
  0x40   : > { %v250_v5 = vld [vmem:[%s211_s17 + $0x28] sm:$0xff]  ;;  %v251_v8 = vld [vmem:[%s211_s17 + $0x30] sm:$0xff]  ;;  %v253_v10 = vld [vmem:[%s211_s17 + $0x40] sm:$0xff]  ;;  %v979_v28 = vadd.f32 %v964_v23, %v962_v22  ;;  %v992_v32 = vadd.f32 %v966_v24, %v969_v25  ;;  %v1002_v35 = vadd.f32 %v964_v23, %v972_v26  ;;  %v1006_v36 = vadd.f32 %v966_v24, %v975_v27  ;;  %s762_s6 = scalar_lea.vmem %s761_s16, 256  ;;  %p763_p7 = scmp.lt.s32.totalorder %s1315_s26, %s761_s16 }
  0x41   : > { %v254_v9 = vld [vmem:[%s211_s17 + $0x48] sm:$0xff]  ;;  %v256_v11 = vld [vmem:[%s211_s17 + $0x58] sm:$0xff]  ;;  %v255_v12 = vld [vmem:[%s211_s17 + $0x50] sm:$0xff]  ;;  %v1019_v40 = vadd.f32 %v964_v23, %v982_v29  ;;  %v1023_v41 = vadd.f32 %v966_v24, %v985_v30  ;;  %v1027_v42 = vadd.f32 %v964_v23, %v988_v31  ;;  %v1038_v46 = vadd.f32 %v966_v24, %v995_v33 }
  0x42   : > { %v258_v13 = vld [vmem:[%s211_s17 + $0x68] sm:$0xff]  ;;  %v257_v14 = vld [vmem:[%s211_s17 + $0x60] sm:$0xff]  ;;  %v260_v15 = vld [vmem:[%s211_s17 + $0x78] sm:$0xff]  ;;  %v1042_v47 = vadd.f32 %v964_v23, %v998_v34  ;;  %v1047_v49 = vadd.f32 %v966_v24, %v1009_v37  ;;  %v1051_v50 = vadd.f32 %v964_v23, %v1012_v38  ;;  %v1055_v51 = vadd.f32 %v966_v24, %v1015_v39 }
  0x43   : > { %278 = vperm.xlu1 %727, %v248_v3   ;;  %268 = vperm.xlu0 %726, %v246_v4   ;;  %v259_v16 = vld [vmem:[%s211_s17 + $0x70] sm:$0xff]  ;;  %v1067_v56 = vadd.f32 %v964_v23, %v1030_v43  ;;  %v1071_v57 = vadd.f32 %v966_v24, %v1033_v44  ;;  %v1080_v62 = vld [vmem:[%s948_s11 + $0x98] sm:$0xff]  ;;  %v1083_v63 = vld [vmem:[%s948_s11 + $0x80] sm:$0xff]  ;;  %v1089_v2 = vadd.f32 %v964_v23, %v1058_v52 }
  0x44   : > { %v1077_v61 = vld [vmem:[%s948_s11 + $0x90] sm:$0xff]  ;;  %v1093_v3 = vadd.f32 %v966_v24, %v1061_v53  ;;  %v1096_v4 = vld [vmem:[%s948_s11 + $0x88] sm:$0xff]  ;;  %v1127_v17 = vld [vmem:[%s948_s11 + $0xd8] sm:$0xff]  ;;  %v1137_v20 = vadd.f32 %v964_v23, %v1083_v63 }
  0x45   : > { %1385 = vst [vmem:[#allocation11_spill] sm:$0xff] %v1127_v17  ;;  %v1130_v18 = vld [vmem:[%s948_s11 + $0xc0] sm:$0xff]  ;;  %v1133_v19 = vld [vmem:[%s948_s11 + $0xc8] sm:$0xff]  ;;  %v1141_v21 = vadd.f32 %v966_v24, %v1096_v4 }
  0x46   : > { %1386 = vst [vmem:[#allocation12_spill] sm:$0xff] %v1130_v18  ;;  %1387 = vst [vmem:[#allocation13_spill] sm:$0xff] %v1133_v19  ;;  %v1171_v1 = vadd.f32 %v964_v23, %v1130_v18  ;;  %v1175_v45 = vadd.f32 %v966_v24, %v1133_v19  ;;  %v1186_v19 = vld [vmem:[%s948_s11 + $0xf0] sm:$0xff] }
  0x47   : > { %288 = vperm.xlu1 %727, %v250_v5   ;;  %283 = vperm.xlu0 %726, %v249_v6   ;;  %v1099_v5 = vld [vmem:[%s948_s11 + $0xb0] sm:$0xff]  ;;  %v1102_v6 = vld [vmem:[%s948_s11 + $0xb8] sm:$0xff]  ;;  %1388 = vst [vmem:[#allocation14_spill] sm:$0xff] %v1141_v21  ;;  %v1203_v21 = vld [vmem:[%s948_s11 + $0xe8] sm:$0xff] }
  0x48   : > { %1393 = vst [vmem:[#allocation19_spill] sm:$0xff] %v1171_v1  ;;  %1394 = vst [vmem:[#allocation20_spill] sm:$0xff] %v1175_v45 }
  0x49   : > { %1396 = vst [vmem:[#allocation22_spill] sm:$0xff] %v1203_v21 }
  0x4b   : > { %298 = vperm.xlu1 %727, %v252_v7   ;;  %293 = vperm.xlu0 %726, %v251_v8   ;;  %v1167_v7 = vadd.f32 %v966_v24, %v1127_v17 }
  0x4d   : > { %1392 = vst [vmem:[#allocation18_spill] sm:$0xff] %v1167_v7 }
  0x4f   : > { %308 = vperm.xlu1 %727, %v254_v9   ;;  %303 = vperm.xlu0 %726, %v253_v10   ;;  %v1108_v10 = vld [vmem:[%s948_s11 + $0xa0] sm:$0xff] }
  0x50   : > { %1382 = vst [vmem:[#allocation8_spill] sm:$0xff] %v1108_v10  ;;  %v1155_v9 = vadd.f32 %v964_v23, %v1108_v10  ;;  %v1189_v10 = vld [vmem:[%s948_s11 + $0xf8] sm:$0xff] }
  0x51   : > { %1395 = vst [vmem:[#allocation21_spill] sm:$0xff] %v1189_v10 }
  0x53   : > { %318 = vperm.xlu1 %727, %v256_v11   ;;  %313 = vperm.xlu0 %726, %v255_v12   ;;  %v1111_v11 = vld [vmem:[%s948_s11 + $0xa8] sm:$0xff]  ;;  %v1114_v12 = vld [vmem:[%s948_s11 + $0xd0] sm:$0xff] }
  0x54   : > { %1383 = vst [vmem:[#allocation9_spill] sm:$0xff] %v1111_v11  ;;  %1384 = vst [vmem:[#allocation10_spill] sm:$0xff] %v1114_v12  ;;  %v1159_v8 = vadd.f32 %v966_v24, %v1111_v11  ;;  %v1163_v48 = vadd.f32 %v964_v23, %v1114_v12  ;;  %v1211_v12 = vadd.f32 %v966_v24, %v1189_v10 }
  0x56   : > { %1391 = vst [vmem:[#allocation17_spill] sm:$0xff] %v1163_v48 }
  0x57   : > { %328 = vperm.xlu1 %727, %v258_v13   ;;  %323 = vperm.xlu0 %726, %v257_v14   ;;  %v1145_v14 = vadd.f32 %v964_v23, %v1099_v5  ;;  %v1149_v13 = vadd.f32 %v966_v24, %v1102_v6 }
  0x59   : > { %1389 = vst [vmem:[#allocation15_spill] sm:$0xff] %v1145_v14  ;;  %1390 = vst [vmem:[#allocation16_spill] sm:$0xff] %v1149_v13  ;;  %v1200_v14 = vld [vmem:[%s948_s11 + $0xe0] sm:$0xff]  ;;  %s756_s11 = scalar_lea.vmem %s1315_s26, 128 }
  0x5a   : > { %p757_p12 = scmp.ne.s32.totalorder %s1315_s26, %s756_s11  ;;  %p764_p8 = scmp.lt.s32.totalorder %s762_s6, %s756_s11 }
  0x5b   : > { %338 = vperm.xlu1 %727, %v260_v15   ;;  %333 = vperm.xlu0 %726, %v259_v16   ;;  %v1120_v15 = vadd.f32 %v964_v23, %v1077_v61  ;;  %v1124_v16 = vadd.f32 %v966_v24, %v1080_v62 }
  0x5c   : > { %p758_p4 = pnand %p757_p12, %p1440_p13  ;;  %p765_p10 = por %p764_p8, %p763_p7 }
  0x5e   : > { %p759_p5 = pneg %p758_p4 }
  0x60   : > { %p766_p0 = pnand %p765_p10, %p759_p5 }
  0xba   : > { %v274_v59 = vpop.permute.xlu1 %273  ;;  %v264_v58 = vpop.permute.xlu0 %263 }
  0xbb   : > { %v341_v0 = vadd.f32 %v264_v58, %v972_v26  ;;  %v342_v60 = vadd.f32 %v264_v58, %v975_v27  ;;  %v345_v26 = vadd.f32 %v274_v59, %v962_v22  ;;  %v346_v27 = vadd.f32 %v274_v59, %v969_v25 }
  0xbc   : > { %v1207_v59 = vadd.f32 %v964_v23, %v1186_v19 }
  0xbd   : > { %v373_v22 = vmax.f32 %v341_v0, 0.0  ;;  %v374_v25 = vmax.f32 %v342_v60, 0.0  ;;  %v377_v58 = vmax.f32 %v345_v26, 0.0  ;;  %v378_v7 = vmax.f32 %v346_v27, 0.0 }
  0xbe   : > { %v279_v54 = vpop.permute.xlu1 %278  ;;  %v269_v55 = vpop.permute.xlu0 %268  ;;  %v1219_v60 = vadd.f32 %v964_v23, %v1200_v14  ;;  %v1223_v0 = vadd.f32 %v966_v24, %v1203_v21  ;;  %v1397_v23 = vmax.f32 %v1002_v35, 0.0  ;;  %v1398_v24 = vmax.f32 %v1006_v36, 0.0 }
  0xbf   : > { %v347_v18 = vadd.f32 %v279_v54, %v982_v29  ;;  %v348_v17 = vadd.f32 %v279_v54, %v985_v30  ;;  %v343_v13 = vadd.f32 %v269_v55, %v988_v31  ;;  %v344_v11 = vadd.f32 %v269_v55, %v995_v33 }
  0xc0   : > { %v481_v26 = vadd.f32 %v1397_v23, %v373_v22  ;;  %v482_v27 = vadd.f32 %v1398_v24, %v374_v25  ;;  %v1402_v35 = vmax.f32 %v992_v32, 0.0  ;;  %v1405_v32 = vmax.f32 %v1051_v50, 0.0 }
  0xc1   : > { %v379_v48 = vmax.f32 %v347_v18, 0.0  ;;  %v380_v45 = vmax.f32 %v348_v17, 0.0  ;;  %v375_v1 = vmax.f32 %v343_v13, 0.0  ;;  %v376_v29 = vmax.f32 %v344_v11, 0.0 }
  0xc2   : > { %v289_v10 = vpop.permute.xlu1 %288  ;;  %v284_v30 = vpop.permute.xlu0 %283  ;;  %v1399_v17 = vmax.f32 %v1027_v42, 0.0  ;;  %v1400_v11 = vmax.f32 %v1038_v46, 0.0  ;;  %v486_v22 = vadd.f32 %v1402_v35, %v378_v7 }
  0xc3   : > { %v351_v31 = vadd.f32 %v289_v10, %v998_v34  ;;  %v352_v33 = vadd.f32 %v289_v10, %v1009_v37  ;;  %v349_v54 = vadd.f32 %v284_v30, %v1012_v38  ;;  %v350_v55 = vadd.f32 %v284_v30, %v1015_v39 }
  0xc4   : > { %v483_v13 = vadd.f32 %v1399_v17, %v375_v1  ;;  %v484_v18 = vadd.f32 %v1400_v11, %v376_v29  ;;  %v479_v37 = vmax.f32 %v1207_v59, 0.0  ;;  %v480_v38 = vmax.f32 %v1211_v12, 0.0 }
  0xc5   : > { %v381_v21 = vmax.f32 %v349_v54, 0.0  ;;  %v382_v34 = vmax.f32 %v350_v55, 0.0  ;;  %v1401_v39 = vmax.f32 %v979_v28, 0.0  ;;  %v1403_v1 = vmax.f32 %v1019_v40, 0.0 }
  0xc6   : > { %v513_v36 = vadd.f32 %v483_v13, %v481_v26  ;;  %v534_v25 = vadd.f32 %v484_v18, %v482_v27  ;;  %v299_v30 = vpop.permute.xlu1 %298  ;;  %v294_v42 = vpop.permute.xlu0 %293  ;;  %v1404_v29 = vmax.f32 %v1023_v41, 0.0  ;;  %v383_v55 = vmax.f32 %v351_v31, 0.0 }
  0xc7   : > { %v485_v10 = vadd.f32 %v1401_v39, %v377_v58  ;;  %v487_v46 = vadd.f32 %v1403_v1, %v379_v48  ;;  %v384_v23 = vmax.f32 %v352_v33, 0.0  ;;  %v355_v28 = vadd.f32 %v299_v30, %v1030_v43 }
  0xc8   : > { %v488_v54 = vadd.f32 %v1404_v29, %v380_v45  ;;  %v535_v17 = vadd.f32 %v534_v25, %v486_v22  ;;  %v356_v58 = vadd.f32 %v299_v30, %v1033_v44  ;;  %v489_v7 = vadd.f32 %v1405_v32, %v381_v21 }
  0xc9   : > { %v514_v24 = vadd.f32 %v513_v36, %v485_v10  ;;  %v1406_v26 = vmax.f32 %v1055_v51, 0.0  ;;  %v353_v40 = vadd.f32 %v294_v42, %v1058_v52  ;;  %v354_v48 = vadd.f32 %v294_v42, %v1061_v53 }
  0xca   : > { %v536_v45 = vadd.f32 %v535_v17, %v488_v54  ;;  %v387_v31 = vmax.f32 %v355_v28, 0.0  ;;  %v388_v33 = vmax.f32 %v356_v58, 0.0  ;;  %v309_v13 = vpop.permute.xlu1 %308  ;;  %v304_v11 = vpop.permute.xlu0 %303  ;;  %v1407_v21 = vmax.f32 %v1042_v47, 0.0 }
  0xcb   : > { %v490_v27 = vadd.f32 %v1406_v26, %v382_v34  ;;  %v515_v41 = vadd.f32 %v514_v24, %v487_v46  ;;  %v385_v18 = vmax.f32 %v353_v40, 0.0  ;;  %v386_v43 = vmax.f32 %v354_v48, 0.0  ;;  %v1416_v26 = vld [vmem:[#allocation9_spill] sm:$0xff] }
  0xcc   : > { %v359_v44 = vadd.f32 %v309_v13, %v1077_v61  ;;  %v360_v50 = vadd.f32 %v309_v13, %v1080_v62  ;;  %v491_v51 = vadd.f32 %v1407_v21, %v383_v55  ;;  %v1408_v34 = vmax.f32 %v1047_v49, 0.0  ;;  %v1421_v21 = vld [vmem:[#allocation11_spill] sm:$0xff] }
  0xcd   : > { %v516_v39 = vadd.f32 %v515_v41, %v489_v7  ;;  %v537_v53 = vadd.f32 %v536_v45, %v490_v27  ;;  %v1409_v10 = vmax.f32 %v1089_v2, 0.0  ;;  %v1410_v22 = vmax.f32 %v1093_v3, 0.0  ;;  %v1415_v7 = vld [vmem:[#allocation8_spill] sm:$0xff] }
  0xce   : > { %v492_v52 = vadd.f32 %v1408_v34, %v384_v23  ;;  %v391_v25 = vmax.f32 %v359_v44, 0.0  ;;  %v392_v30 = vmax.f32 %v360_v50, 0.0  ;;  %v357_v62 = vadd.f32 %v304_v11, %v1083_v63  ;;  %v319_v1 = vpop.permute.xlu1 %318  ;;  %v314_v46 = vpop.permute.xlu0 %313  ;;  %v1420_v44 = vld [vmem:[#allocation10_spill] sm:$0xff] }
  0xcf   : > { %v493_v35 = vadd.f32 %v1409_v10, %v385_v18  ;;  %v494_v36 = vadd.f32 %v1410_v22, %v386_v43  ;;  %v517_v42 = vadd.f32 %v516_v39, %v491_v51  ;;  %v358_v47 = vadd.f32 %v304_v11, %v1096_v4 }
  0xd0   : > { %v538_v61 = vadd.f32 %v537_v53, %v492_v52  ;;  %v1411_v49 = vmax.f32 %v1067_v56, 0.0  ;;  %v1412_v54 = vmax.f32 %v1071_v57, 0.0  ;;  %v363_v55 = vadd.f32 %v319_v1, %v1099_v5  ;;  %v1418_v5 = vld [vmem:[#allocation14_spill] sm:$0xff]  ;;  %v1424_v53 = vld [vmem:[#allocation12_spill] sm:$0xff] }
  0xd1   : > { %v364_v3 = vadd.f32 %v319_v1, %v1102_v6  ;;  %v518_v23 = vadd.f32 %v517_v42, %v493_v35  ;;  %v389_v17 = vmax.f32 %v357_v62, 0.0  ;;  %v390_v28 = vmax.f32 %v358_v47, 0.0  ;;  %v1425_v35 = vld [vmem:[#allocation13_spill] sm:$0xff] }
  0xd2   : > { %v495_v29 = vadd.f32 %v1411_v49, %v387_v31  ;;  %v496_v2 = vadd.f32 %v1412_v54, %v388_v33  ;;  %v539_v24 = vadd.f32 %v538_v61, %v494_v36  ;;  %v1413_v63 = vmax.f32 %v1120_v15, 0.0  ;;  %v329_v31 = vpop.permute.xlu1 %328  ;;  %v324_v33 = vpop.permute.xlu0 %323 }
  0xd3   : > { %v1414_v4 = vmax.f32 %v1124_v16, 0.0  ;;  %v361_v56 = vadd.f32 %v314_v46, %v1415_v7  ;;  %v362_v27 = vadd.f32 %v314_v46, %v1416_v26  ;;  %v1417_v57 = vmax.f32 %v1137_v20, 0.0  ;;  %v1426_v46 = vld [vmem:[#allocation21_spill] sm:$0xff] }
  0xd4   : > { %v499_v58 = vadd.f32 %v1413_v63, %v391_v25  ;;  %v1419_v48 = vmax.f32 %v1418_v5, 0.0  ;;  %v519_v41 = vadd.f32 %v518_v23, %v495_v29  ;;  %v540_v45 = vadd.f32 %v539_v24, %v496_v2  ;;  %v1427_v29 = vld [vmem:[#allocation15_spill] sm:$0xff]  ;;  %v1429_v2 = vld [vmem:[#allocation16_spill] sm:$0xff]  ;;  %v1436_v5 = vld [vmem:[#allocation17_spill] sm:$0xff] }
  0xd5   : > { %v500_v32 = vadd.f32 %v1414_v4, %v392_v30  ;;  %v497_v40 = vadd.f32 %v1417_v57, %v389_v17  ;;  %v395_v13 = vmax.f32 %v363_v55, 0.0  ;;  %v396_v15 = vmax.f32 %v364_v3, 0.0  ;;  %v1431_v17 = vld [vmem:[#allocation19_spill] sm:$0xff]  ;;  %v1435_v57 = vld [vmem:[#allocation22_spill] sm:$0xff] }
  0xd6   : > { %v498_v6 = vadd.f32 %v1419_v48, %v390_v28  ;;  %v393_v11 = vmax.f32 %v361_v56, 0.0  ;;  %v394_v18 = vmax.f32 %v362_v27, 0.0  ;;  %v367_v50 = vadd.f32 %v329_v31, %v1420_v44  ;;  %v339_v61 = vpop.permute.xlu1 %338 }
  0xd7   : > { %v520_v16 = vadd.f32 %v519_v41, %v497_v40  ;;  %v368_v51 = vadd.f32 %v329_v31, %v1421_v21  ;;  %v1422_v20 = vmax.f32 %v1155_v9, 0.0  ;;  %v1423_v52 = vmax.f32 %v1159_v8, 0.0  ;;  %v334_v9 = vpop.permute.xlu0 %333  ;;  %v1438_v41 = vld [vmem:[#allocation18_spill] sm:$0xff] }
  0xd8   : > { %v541_v43 = vadd.f32 %v540_v45, %v498_v6  ;;  %v365_v10 = vadd.f32 %v324_v33, %v1424_v53  ;;  %v366_v22 = vadd.f32 %v324_v33, %v1425_v35  ;;  %v399_v30 = vmax.f32 %v367_v50, 0.0 }
  0xd9   : > { %v501_v34 = vadd.f32 %v1422_v20, %v393_v11  ;;  %v502_v39 = vadd.f32 %v1423_v52, %v394_v18  ;;  %v521_v36 = vadd.f32 %v520_v16, %v499_v58  ;;  %v400_v42 = vmax.f32 %v368_v51, 0.0  ;;  %v1433_v58 = vld [vmem:[#allocation20_spill] sm:$0xff] }
  0xda   : > { %v542_v25 = vadd.f32 %v541_v43, %v500_v32  ;;  %v397_v62 = vmax.f32 %v365_v10, 0.0  ;;  %v398_v47 = vmax.f32 %v366_v22, 0.0  ;;  %v371_v1 = vadd.f32 %v339_v61, %v1186_v19 }
  0xdb   : > { %v372_v49 = vadd.f32 %v339_v61, %v1426_v46  ;;  %v1428_v54 = vmax.f32 %v1427_v29, 0.0  ;;  %v1430_v55 = vmax.f32 %v1429_v2, 0.0  ;;  %v522_v23 = vadd.f32 %v521_v36, %v501_v34 }
  0xdc   : > { %v543_v24 = vadd.f32 %v542_v25, %v502_v39  ;;  %v1432_v28 = vmax.f32 %v1431_v17, 0.0  ;;  %v1434_v4 = vmax.f32 %v1433_v58, 0.0  ;;  %v477_v7 = vmax.f32 %v1219_v60, 0.0 }
  0xdd   : > { %v503_v8 = vadd.f32 %v1428_v54, %v395_v13  ;;  %v504_v3 = vadd.f32 %v1430_v55, %v396_v15  ;;  %v478_v19 = vmax.f32 %v1223_v0, 0.0  ;;  %v369_v27 = vadd.f32 %v334_v9, %v1200_v14 }
  0xde   : > { %v505_v63 = vadd.f32 %v1432_v28, %v397_v62  ;;  %v506_v32 = vadd.f32 %v1434_v4, %v398_v47  ;;  %v370_v40 = vadd.f32 %v334_v9, %v1435_v57  ;;  %v1437_v48 = vmax.f32 %v1436_v5, 0.0 }
  0xdf   : > { %v523_v56 = vadd.f32 %v522_v23, %v503_v8  ;;  %v544_v26 = vadd.f32 %v543_v24, %v504_v3  ;;  %v1439_v45 = vmax.f32 %v1438_v41, 0.0  ;;  %v403_v33 = vmax.f32 %v371_v1, 0.0 }
  0xe0   : > { %v507_v6 = vadd.f32 %v1437_v48, %v399_v30  ;;  %v404_v13 = vmax.f32 %v372_v49, 0.0  ;;  %v401_v18 = vmax.f32 %v369_v27, 0.0  ;;  %v402_v60 = vmax.f32 %v370_v40, 0.0 }
  0xe1   : > { %v508_v31 = vadd.f32 %v1439_v45, %v400_v42  ;;  %v524_v15 = vadd.f32 %v523_v56, %v505_v63  ;;  %v545_v11 = vadd.f32 %v544_v26, %v506_v32  ;;  %v511_v14 = vadd.f32 %v479_v37, %v403_v33 }
  0xe2   : > { %v509_v16 = vadd.f32 %v477_v7, %v401_v18  ;;  %v510_v0 = vadd.f32 %v478_v19, %v402_v60  ;;  %v512_v50 = vadd.f32 %v480_v38, %v404_v13 }
  0xe3   : > { %v525_v43 = vadd.f32 %v524_v15, %v507_v6  ;;  %v546_v44 = vadd.f32 %v545_v11, %v508_v31 }
  0xe5   : > { %v526_v21 = vadd.f32 %v525_v43, %v509_v16  ;;  %v547_v51 = vadd.f32 %v546_v44, %v510_v0 }
  0xe7   : > { %v527_v20 = vadd.f32 %v526_v21, %v511_v14  ;;  %v548_v34 = vadd.f32 %v547_v51, %v512_v50 }
  0xe9   : > { %v528_v52 = vrot.slane %v527_v20, 4  ;;  %v549_v39 = vrot.slane %v548_v34, 4 }
  0xeb   : > { %v529_v53 = vadd.f32 %v528_v52, %v527_v20  ;;  %v550_v10 = vadd.f32 %v549_v39, %v548_v34 }
  0xed   : > { %v530_v35 = vrot.slane %v529_v53, 2  ;;  %v551_v22 = vrot.slane %v550_v10, 2 }
  0xef   : > { %v531_v36 = vadd.f32 %v530_v35, %v529_v53  ;;  %v552_v25 = vadd.f32 %v551_v22, %v550_v10 }
  0xf1   : > { %v532_v30 = vrot.slane %v531_v36, 1  ;;  %v553_v59 = vrot.slane %v552_v25, 1 }
  0xf3   : > { %v533_v37 = vadd.f32 %v532_v30, %v531_v36  ;;  %v554_v12 = vadd.f32 %v553_v59, %v552_v25 }
  0xf5   : > { %v555_v38 = vadd.f32 %v554_v12, %v533_v37 }
  0xf7   : > { %556 = vadd.xlane.f32.xlu0 %v555_v38 }
 0x180   : > { %v557_v42 = vpop.xlane.xlu0 %556 }
 0x181   : > { %675 = vpush %v557_v42 }
 0x1b2   : > { %s676_s28 = spop %675 }
 0x1b3   : > { %v559_v61 = vstv %s676_s28 }
 0x1b4   : > { %560 = vst [vmem:[%s205_s22] sm:$0xff] %v559_v61 }
 0x1b5   : > { %769 = shalt.err (!%p766_p0)
}
 0x1b6   : > { %s770_s7 = scalar_lea.hbm %s573_s9, 128  ;;  %s774_s17 = scalar_lea.hbm %s1358_s3, 256 }
 0x1b7   : > { %p771_p2 = scmp.ne.s32.totalorder %s573_s9, %s770_s7  ;;  %p775_p3 = scmp.lt.s32.totalorder %s573_s9, %s1358_s3 }
 0x1b8   : > { %p776_p6 = scmp.lt.s32.totalorder %s774_s17, %s770_s7 }
 0x1b9   : > { %p772_p9 = pnand %p771_p2, %p1440_p13 }
 0x1ba   : > { %p777_p11 = por %p776_p6, %p775_p3 }
 0x1bb   : > { %p773_p1 = pneg %p772_p9 }
 0x1bd   : > { %p778_p12 = pnand %p777_p11, %p773_p1 }
 0x1bf   : > { %781 = shalt.err (!%p778_p12)
}
 0x1c0   : > { %679 = dma.vmem_to_hbm [thread:$0]  (%p1440_p13), %s1315_s26, 128, %s573_s9, %s562_s10  }
 0x1c1 PF: > { %s587_s20 = sand.u32 1, %s808_s12   ;;  %p1441_p4 = scmp.ne.s32.totalorder %s1379_s25, 0 }
 0x1c2   : > { %p1442_p5 = scmp.ge.s32.totalorder %s820_s15, 2  ;;  %s588_s22 = scalar_lea.sflag [#allocation4], %s587_s20 }
 0x1c4   : > { %p686_p7 = pnand %p1442_p5, %p1441_p4 }
 0x1c6   : > { %p687_p8 = pneg %p686_p7 }
 0x1c8   : > { %803 = dma.done.wait (%p687_p8), %s588_s22, 128  }
 0x1c9   : > { %805 = vsyncadd (%p687_p8), %s588_s22, 4294967168  ;;  %p16_p10 = scmp.ge.s32.totalorder %s872_s18, 4   ;;  %s1443_s12 = smov %s812_s13 }
 0x1ca   : > { %s1444_s13 = smov %s816_s14  ;;  %s1445_s14 = smov %s884_s21 }
 0x1cb   : > { %s1446_s15 = smov %s872_s18  ;;  %18 = sbr.rel (!%p16_p10) target bundleno = 5 (0x5), region = 80 }
 0x1d0   :  { %593 = vsyncpa [#allocation3], 1 }
 0x1d1   :  { %595 = vsyncpa [#allocation3 + $0x1], 1 }
 0x1d2   :  { %596 = vsyncpa [#allocation4], 1 }
 0x1d3   :  { %598 = vsyncpa [#allocation4 + $0x1], 1 }

</bundles_post_ra>
